<compile_context>
chip_gen: v7x
topology: tpu7x:2x2x1
jax: 0.10.0
libtpu: 0.0.40
codegen_flags: <defaults>
</compile_context>

<pallas_src>
import jax
import jax.numpy as jnp
from jax.experimental import pallas as pl
from jax.experimental.pallas import tpu as pltpu


def _round_up(v, m):
    return (v + m - 1) // m * m


def _sublane_min(dtype):
    # f32 -> 8 rows, bf16 -> 16, int8/fp8 -> 32 (packed sublanes).
    return {4: 8, 2: 16, 1: 32}.get(jnp.dtype(dtype).itemsize, 8)


def _largest_dividing_multiple(total, base, cap):
    """Largest multiple of `base` that divides `total` and is <= cap (min `base`)."""
    best = base
    d = base
    limit = min(total, cap)
    while d <= limit:
        if total % d == 0:
            best = d
        d += base
    return best


# ----------------------------------------------------------------------------
# Pallas kernel: tiled matmul, bias seeded into the f32 accumulator
# ----------------------------------------------------------------------------
def _linear_kernel(x_ref, w_ref, b_ref, o_ref, acc_ref):
    # K (reduction) is grid axis 2 ("arbitrary"): accumulator is resident across it.
    @pl.when(pl.program_id(2) == 0)
    def _():
        # Seed the accumulator with the broadcast bias -> no epilogue VPU add.
        acc_ref[...] = jnp.broadcast_to(
            b_ref[...].astype(jnp.float32), acc_ref.shape)

    acc_ref[...] += jnp.dot(
        x_ref[...], w_ref[...], preferred_element_type=jnp.float32)

    @pl.when(pl.program_id(2) == pl.num_programs(2) - 1)
    def _():
        o_ref[...] = acc_ref[...].astype(o_ref.dtype)


# ----------------------------------------------------------------------------
# One-time parameter preparation (hoisted out of the per-call path)
# ----------------------------------------------------------------------------
def prepare_linear_params(w, b, *, compute_dtype=jnp.bfloat16):
    """Pad W/b to (128,128)-aligned shapes and cast W to the compute dtype ONCE.

    w: (K, N), b: (N,).  Returns (w_padded, b_padded_row).
    """
    K, N = w.shape
    Kp = _round_up(K, 128)
    Np = _round_up(N, 128)
    wp = jnp.pad(w.astype(compute_dtype), ((0, Kp - K), (0, Np - N)))
    bp = jnp.pad(b.astype(jnp.float32), (0, Np - N)).reshape(1, Np)
    return wp, bp


# ----------------------------------------------------------------------------
# y = x @ W + b  on pre-padded parameters
# ----------------------------------------------------------------------------
def linear_pallas(x, w_padded, b_padded, *, n_out,
                  tm_cap=512, tk_cap=2048, tn_cap=1024,
                  tile_budget_bytes=28 * 1024 * 1024,
                  out_dtype=jnp.float32):
    M, K = x.shape
    Kp, Np = w_padded.shape
    compute_dtype = w_padded.dtype
    in_item = jnp.dtype(compute_dtype).itemsize
    out_item = jnp.dtype(out_dtype).itemsize

    sub = _sublane_min(compute_dtype)
    Mp0 = _round_up(M, sub)

    def footprint(tm, tk, tn):
        return (2 * (tm * tk + tk * tn) * in_item   # double-buffered x / W tiles
                + 2 * tm * tn * out_item            # double-buffered output tile
                + 2 * tn * 4                        # bias tile
                + tm * tn * 4)                      # f32 accumulator scratch

    # Pick the biggest tiles that fit the VMEM budget; tk/tn divide Kp/Np exactly.
    tm_c, tk_c, tn_c = tm_cap, tk_cap, tn_cap
    while True:
        tk = _largest_dividing_multiple(Kp, 128, tk_c)
        tn = _largest_dividing_multiple(Np, 128, tn_c)
        tm = min(Mp0, max(sub, (tm_c // sub) * sub))
        if footprint(tm, tk, tn) <= tile_budget_bytes:
            break
        if tk > 128:                 # shrink K first: no extra W HBM traffic
            tk_c = max(128, tk // 2)
        elif tn > 128:
            tn_c = max(128, tn // 2)
        elif tm > sub:
            tm_c = max(sub, tm // 2)
        else:
            break

    Mp = _round_up(Mp0, tm)

    # v7x megacore: try to get >=2 blocks along a "parallel" axis (no-op if impossible).
    if (Mp // tm) * (Np // tn) == 1:
        if Np >= 256:
            tn2 = _largest_dividing_multiple(Np, 128, Np - 128)
            if tn2 < Np:
                tn = tn2
        elif Mp0 // sub >= 2 and (Mp0 // 2) % sub == 0:
            tm = Mp0 // 2
    Mp = _round_up(Mp0, tm)

    # Per-call activation pad/cast only (x is small relative to W).
    xp = jnp.pad(x.astype(compute_dtype), ((0, Mp - M), (0, Kp - K)))

    grid = (Mp // tm, Np // tn, Kp // tk)

    cost = pl.CostEstimate(
        flops=2 * Mp * Np * Kp,
        transcendentals=0,
        bytes_accessed=(Mp * Kp * in_item * (Np // tn)
                        + Kp * Np * in_item * (Mp // tm)
                        + Np * 4
                        + Mp * Np * out_item),
    )

    out = pl.pallas_call(
        _linear_kernel,
        grid_spec=pltpu.PrefetchScalarGridSpec(
            num_scalar_prefetch=0,
            grid=grid,
            in_specs=[
                pl.BlockSpec((tm, tk), lambda i, j, k: (i, k)),
                pl.BlockSpec((tk, tn), lambda i, j, k: (k, j)),
                pl.BlockSpec((1, tn), lambda i, j, k: (0, j)),
            ],
            out_specs=pl.BlockSpec((tm, tn), lambda i, j, k: (i, j)),
            scratch_shapes=[pltpu.VMEM((tm, tn), jnp.float32)],
        ),
        out_shape=jax.ShapeDtypeStruct((Mp, Np), out_dtype),
        compiler_params=pltpu.CompilerParams(
            dimension_semantics=("parallel", "parallel", "arbitrary"),
            vmem_limit_bytes=48 * 1024 * 1024,   # safe on v7x (64 MiB), fine on v5e/v6e
        ),
        cost_estimate=cost,
    )(xp, w_padded, b_padded)

    if Mp == M and Np == n_out:
        return out
    return out[:M, :n_out]


# ----------------------------------------------------------------------------
# Module: x.view(B, -1) -> fc
# ----------------------------------------------------------------------------
def make_linear_layer_concept(w, b, *, compute_dtype=jnp.bfloat16):
    """Returns (params, forward) for LinearLayerConcept.

    Parameters are padded/cast once; `forward(params, x)` is the per-call path
    (flatten is a zero-cost reshape; the Linear is the Pallas kernel above).
    """
    n_out = w.shape[1]
    params = prepare_linear_params(w, b, compute_dtype=compute_dtype)

    def forward(params, x):
        wp, bp = params
        xf = x.reshape(x.shape[0], -1)          # x.view(x.shape[0], -1)
        return linear_pallas(xf, wp, bp, n_out=n_out)

    return params, forward


if __name__ == "__main__":
    key = jax.random.PRNGKey(0)

    # Small shapes consistent with the module: (B, C, H, W) flattened -> input_dim.
    batch, C, H, W = 2, 4, 16, 16
    input_dim = C * H * W                       # 1024
    output_dim = 32

    kx, kw, kb = jax.random.split(key, 3)
    x = jax.random.normal(kx, (batch, C, H, W), jnp.float32)

    # nn.Linear default init: U(-1/sqrt(in), 1/sqrt(in)); stored as (in, out).
    bound = 1.0 / (input_dim ** 0.5)
    w = jax.random.uniform(kw, (input_dim, output_dim), jnp.float32, -bound, bound)
    b = jax.random.uniform(kb, (output_dim,), jnp.float32, -bound, bound)

    y_ref = x.reshape(batch, -1) @ w + b        # plain-JAX reference

    # f32 compute path: exact nn.Linear numerics.
    params32, fwd32 = make_linear_layer_concept(w, b, compute_dtype=jnp.float32)
    y32 = jax.block_until_ready(jax.jit(fwd32)(params32, x))
    assert y32.shape == (batch, output_dim), y32.shape
    assert bool(jnp.all(jnp.isfinite(y32)))
    assert bool(jnp.allclose(y32, y_ref, atol=1e-4, rtol=1e-4))

    # bf16 operands / f32 accumulation path (default perf path; weights cast once).
    params16, fwd16 = make_linear_layer_concept(w, b, compute_dtype=jnp.bfloat16)
    y16 = jax.block_until_ready(jax.jit(fwd16)(params16, x))
    assert y16.shape == (batch, output_dim), y16.shape
    assert bool(jnp.all(jnp.isfinite(y16)))
    assert bool(jnp.allclose(y16, y_ref, atol=3e-2, rtol=3e-2))

    print("KERNEL_OK")
</pallas_src>

<mosaic_0001>
module attributes {stable_mosaic.version = 11 : i64} {
  func.func @_linear_kernel(%arg0: i32, %arg1: i32, %arg2: i32, %arg3: memref<8x1024xf32, #tpu.memory_space<vmem>>, %arg4: memref<1024x128xf32, #tpu.memory_space<vmem>>, %arg5: memref<1x128xf32, #tpu.memory_space<vmem>>, %arg6: memref<8x128xf32, #tpu.memory_space<vmem>>, %arg7: memref<8x128xf32, #tpu.memory_space<vmem>>) attributes {dimension_semantics = [#tpu.dimension_semantics<parallel>, #tpu.dimension_semantics<parallel>, #tpu.dimension_semantics<arbitrary>], iteration_bounds = array<i64: 1, 1, 1>, scalar_prefetch = 0 : i64, scratch_operands = 1 : i64, tpu.core_type = #tpu.core_type<tc>, window_params = [{transform_indices = @transform_0, window_bounds = array<i64: 8, 1024>}, {transform_indices = @transform_1, window_bounds = array<i64: 1024, 128>}, {transform_indices = @transform_2, window_bounds = array<i64: 1, 128>}, {transform_indices = @transform_3, window_bounds = array<i64: 8, 128>}]} {
    %c0_i32 = arith.constant 0 : i32
    %0 = arith.cmpi eq, %arg2, %c0_i32 : i32
    %1 = arith.extui %0 : i1 to i32
    %c0_i32_0 = arith.constant 0 : i32
    %2 = arith.cmpi ne, %1, %c0_i32_0 : i32
    scf.if %2 {
      %c0_10 = arith.constant 0 : index
      %c0_11 = arith.constant 0 : index
      %12 = vector.load %arg5[%c0_10, %c0_11] : memref<1x128xf32, #tpu.memory_space<vmem>>, vector<1x128xf32>
      %13 = vector.shape_cast %12 : vector<1x128xf32> to vector<1x128xf32>
      %14 = vector.broadcast %13 : vector<1x128xf32> to vector<8x128xf32>
      %c0_12 = arith.constant 0 : index
      %c0_13 = arith.constant 0 : index
      %15 = vector.load %arg7[%c0_12, %c0_13] : memref<8x128xf32, #tpu.memory_space<vmem>>, vector<8x128xf32>
      tpu.vector_store %arg7[%c0_12, %c0_13], %14 {strides = array<i32>} : memref<8x128xf32, #tpu.memory_space<vmem>>, vector<8x128xf32>,
    } else {
    }
    %c0 = arith.constant 0 : index
    %c0_1 = arith.constant 0 : index
    %3 = vector.load %arg7[%c0, %c0_1] : memref<8x128xf32, #tpu.memory_space<vmem>>, vector<8x128xf32>
    %c0_2 = arith.constant 0 : index
    %c0_3 = arith.constant 0 : index
    %4 = vector.load %arg3[%c0_2, %c0_3] : memref<8x1024xf32, #tpu.memory_space<vmem>>, vector<8x1024xf32>
    %c0_4 = arith.constant 0 : index
    %c0_5 = arith.constant 0 : index
    %5 = vector.load %arg4[%c0_4, %c0_5] : memref<1024x128xf32, #tpu.memory_space<vmem>>, vector<1024x128xf32>
    %cst = arith.constant dense<0.000000e+00> : vector<8x128xf32>
    %6 = tpu.matmul %4, %5, %cst {dimension_numbers = #tpu.dot_dimension_numbers<[1], [0], [0], [1], [0, 0, 1, 1], [], []>} : vector<8x1024xf32>, vector<1024x128xf32>, vector<8x128xf32> -> vector<8x128xf32>
    %7 = arith.addf %3, %6 : vector<8x128xf32>
    %c0_6 = arith.constant 0 : index
    %c0_7 = arith.constant 0 : index
    %8 = vector.load %arg7[%c0_6, %c0_7] : memref<8x128xf32, #tpu.memory_space<vmem>>, vector<8x128xf32>
    tpu.vector_store %arg7[%c0_6, %c0_7], %7 {strides = array<i32>} : memref<8x128xf32, #tpu.memory_space<vmem>>, vector<8x128xf32>,
    %c0_i32_8 = arith.constant 0 : i32
    %9 = arith.cmpi eq, %arg2, %c0_i32_8 : i32
    %10 = arith.extui %9 : i1 to i32
    %c0_i32_9 = arith.constant 0 : i32
    %11 = arith.cmpi ne, %10, %c0_i32_9 : i32
    scf.if %11 {
      %c0_10 = arith.constant 0 : index
      %c0_11 = arith.constant 0 : index
      %12 = vector.load %arg7[%c0_10, %c0_11] : memref<8x128xf32, #tpu.memory_space<vmem>>, vector<8x128xf32>
      %c0_12 = arith.constant 0 : index
      %c0_13 = arith.constant 0 : index
      %13 = vector.load %arg6[%c0_12, %c0_13] : memref<8x128xf32, #tpu.memory_space<vmem>>, vector<8x128xf32>
      tpu.vector_store %arg6[%c0_12, %c0_13], %12 {strides = array<i32>} : memref<8x128xf32, #tpu.memory_space<vmem>>, vector<8x128xf32>,
    } else {
    }
    return
  }
  func.func @transform_0(%arg0: i32, %arg1: i32, %arg2: i32) -> (i32, i32) {
    %c0_i32 = arith.constant 0 : i32
    return %arg0, %arg2 : i32, i32
  }
  func.func @transform_1(%arg0: i32, %arg1: i32, %arg2: i32) -> (i32, i32) {
    %c0_i32 = arith.constant 0 : i32
    return %arg2, %arg1 : i32, i32
  }
  func.func @transform_2(%arg0: i32, %arg1: i32, %arg2: i32) -> (i32, i32) {
    %c0_i32 = arith.constant 0 : i32
    %c0_i32_0 = arith.constant 0 : i32
    return %c0_i32, %arg1 : i32, i32
  }
  func.func @transform_3(%arg0: i32, %arg1: i32, %arg2: i32) -> (i32, i32) {
    %c0_i32 = arith.constant 0 : i32
    return %arg0, %arg1 : i32, i32
  }
}

</mosaic_0001>

<bundles_post_ra>
// kernel: forward.1
= control target key start
LH: loop header
LB: loop body
LE: loop exit
PB: predicated region body
PF: predicated region fallthrough
CT: control target
= control target key end

     0   :  { %8 = vsyncpa [#allocation4], 0  ;;  %s765_s12 = smov [#allocation3]   ;;  %s830_s0 = inlined_call_operand.vmem [shape: f32[8,1024], index: 0, kind: input, shape index: {}]   ;;  %s831_s1 = inlined_call_operand.hbm [shape: f32[1024,128], index: 1, kind: input, shape index: {}]   ;;  %s832_s2 = inlined_call_operand.vmem [shape: f32[1,128], index: 2, kind: input, shape index: {}]   ;;  %s833_s3 = inlined_call_operand.vmem [shape: f32[8,128], index: 3, kind: output, shape index: {}]  }
   0x1   :  { %s16_s13 = sshll.u32 %s765_s12, 4  ;;  %s741_s16 = scalar_lea.hbm %s831_s1, 16384  ;;  %s17_s13 = int_to_ptr.vmem [resolvable:$true] %s16_s13 }
   0x2   :  { %p742_p0 = scmp.ne.s32.totalorder %s831_s1, %s741_s16  ;;  %p745_p1 = scmp.lt.u32.totalorder %s741_s16, %s831_s1 }
   0x4   :  { %p747_p2 = pnand %p745_p1, %p742_p0 }
   0x6   :  { %750 = shalt.err (!%p747_p2)
}
   0x7   :  { %s751_s21 = scalar_lea.vmem %s17_s13, 16384  ;;  %p756_p4 = scmp.lt.s32.totalorder %s17_s13, %s17_s13 }
   0x8   :  { %p752_p3 = scmp.ne.s32.totalorder %s17_s13, %s751_s21  ;;  %p757_p5 = scmp.lt.s32.totalorder %s751_s21, %s751_s21 }
   0xa   :  { %p758_p6 = por %p757_p5, %p756_p4 }
   0xc   :  { %p759_p7 = pnand %p758_p6, %p752_p3 }
   0xe   :  { %762 = shalt.err (!%p759_p7)
}
   0xf   :  { %s766_s22 = smov 128   ;;  %s767_s23 = smov 8  }
  0x10   :  { %22 = dma.hbm_to_vmem [thread:$0]  %s831_s1, 16384, %s17_s13, [#allocation4], %s766_s22, %s766_s22, %s767_s23  }
  0x11   :  { %763 = dma.done.wait [#allocation4], 16384  }
  0x12   :  { %764 = vsyncadd [#allocation4], 4294950912  ;;  %v65_v0 = vld [vmem:[#allocation3 + $0x80] sm:$0xff]  ;;  %v66_v1 = vld [vmem:[#allocation3 + $0x88] sm:$0xff] }
  0x13   :  { %v97_v2 = vld [vmem:[#allocation3 + $0x180] sm:$0xff]  ;;  %v610_v3 = vpack.c.bf16 %v66_v1, %v65_v0  ;;  %v98_v4 = vld [vmem:[#allocation3 + $0x188] sm:$0xff]  ;;  %v67_v11 = vld [vmem:[#allocation3 + $0x90] sm:$0xff] }
  0x14   :  { %v49_v5 = vld [vmem:[#allocation3] sm:$0xff]  ;;  %v50_v6 = vld [vmem:[#allocation3 + $0x8] sm:$0xff]  ;;  %v642_v7 = vpack.c.bf16 %v98_v4, %v97_v2  ;;  %v68_v13 = vld [vmem:[#allocation3 + $0x98] sm:$0xff] }
  0x15   :  { %v612_v8 = vpack.c.bf16 %v50_v6, %v49_v5  ;;  %v81_v9 = vld [vmem:[#allocation3 + $0x100] sm:$0xff]  ;;  %v82_v10 = vld [vmem:[#allocation3 + $0x108] sm:$0xff]  ;;  %611 = vmatprep.subr.bf16.mxu0 %v610_v3  ;;  %v99_v14 = vld [vmem:[#allocation3 + $0x190] sm:$0xff]  ;;  %v614_v16 = vpack.c.bf16 %v68_v13, %v67_v11 }
  0x16   :  { %v644_v12 = vpack.c.bf16 %v82_v10, %v81_v9  ;;  %v100_v15 = vld [vmem:[#allocation3 + $0x198] sm:$0xff]  ;;  %643 = vmatprep.subr.bf16.mxu1 %v642_v7  ;;  %v51_v18 = vld [vmem:[#allocation3 + $0x10] sm:$0xff]  ;;  %v69_v23 = vld [vmem:[#allocation3 + $0xa0] sm:$0xff] }
  0x17   :  { %613 = vmatpush3.bf16.msra.mxu0 %v612_v8  ;;  %v646_v17 = vpack.c.bf16 %v100_v15, %v99_v14  ;;  %v52_v19 = vld [vmem:[#allocation3 + $0x18] sm:$0xff]  ;;  %v83_v20 = vld [vmem:[#allocation3 + $0x110] sm:$0xff]  ;;  %v70_v24 = vld [vmem:[#allocation3 + $0xa8] sm:$0xff] }
  0x18   :  { %645 = vmatpush3.bf16.msra.mxu1 %v644_v12  ;;  %v616_v21 = vpack.c.bf16 %v52_v19, %v51_v18  ;;  %v84_v22 = vld [vmem:[#allocation3 + $0x118] sm:$0xff]  ;;  %615 = vmatprep.subr.bf16.mxu0 %v614_v16  ;;  %v618_v26 = vpack.c.bf16 %v70_v24, %v69_v23  ;;  %v101_v27 = vld [vmem:[#allocation3 + $0x1a0] sm:$0xff]  ;;  %v102_v28 = vld [vmem:[#allocation3 + $0x1a8] sm:$0xff] }
  0x19   :  { %647 = vmatprep.subr.bf16.mxu1 %v646_v17  ;;  %v648_v25 = vpack.c.bf16 %v84_v22, %v83_v20  ;;  %v53_v29 = vld [vmem:[#allocation3 + $0x20] sm:$0xff]  ;;  %v650_v30 = vpack.c.bf16 %v102_v28, %v101_v27  ;;  %v54_v31 = vld [vmem:[#allocation3 + $0x28] sm:$0xff]  ;;  %v71_v35 = vld [vmem:[#allocation3 + $0xb0] sm:$0xff] }
  0x1a   :  { %v85_v32 = vld [vmem:[#allocation3 + $0x120] sm:$0xff]  ;;  %v86_v33 = vld [vmem:[#allocation3 + $0x128] sm:$0xff]  ;;  %v620_v34 = vpack.c.bf16 %v54_v31, %v53_v29  ;;  %v72_v36 = vld [vmem:[#allocation3 + $0xb8] sm:$0xff] }
  0x1b   :  { %617 = vmatpush3.bf16.msra.mxu0 %v616_v21  ;;  %v103_v37 = vld [vmem:[#allocation3 + $0x1b0] sm:$0xff]  ;;  %v652_v38 = vpack.c.bf16 %v86_v33, %v85_v32  ;;  %v622_v39 = vpack.c.bf16 %v72_v36, %v71_v35  ;;  %v104_v40 = vld [vmem:[#allocation3 + $0x1b8] sm:$0xff]  ;;  %v73_v46 = vld [vmem:[#allocation3 + $0xc0] sm:$0xff] }
  0x1c   :  { %649 = vmatpush3.bf16.msra.mxu1 %v648_v25  ;;  %619 = vmatprep.subr.bf16.mxu0 %v618_v26  ;;  %v55_v41 = vld [vmem:[#allocation3 + $0x30] sm:$0xff]  ;;  %v56_v42 = vld [vmem:[#allocation3 + $0x38] sm:$0xff]  ;;  %v654_v43 = vpack.c.bf16 %v104_v40, %v103_v37  ;;  %v74_v47 = vld [vmem:[#allocation3 + $0xc8] sm:$0xff] }
  0x1d   :  { %651 = vmatprep.subr.bf16.mxu1 %v650_v30  ;;  %v87_v44 = vld [vmem:[#allocation3 + $0x130] sm:$0xff]  ;;  %v88_v45 = vld [vmem:[#allocation3 + $0x138] sm:$0xff]  ;;  %v105_v48 = vld [vmem:[#allocation3 + $0x1c0] sm:$0xff]  ;;  %v624_v50 = vpack.c.bf16 %v56_v42, %v55_v41  ;;  %v626_v52 = vpack.c.bf16 %v74_v47, %v73_v46 }
  0x1e   :  { %v106_v49 = vld [vmem:[#allocation3 + $0x1c8] sm:$0xff]  ;;  %v656_v51 = vpack.c.bf16 %v88_v45, %v87_v44  ;;  %v57_v53 = vld [vmem:[#allocation3 + $0x40] sm:$0xff]  ;;  %v75_v58 = vld [vmem:[#allocation3 + $0xd0] sm:$0xff] }
  0x1f   :  { %621 = vmatpush3.bf16.msra.mxu0 %v620_v34  ;;  %v58_v54 = vld [vmem:[#allocation3 + $0x48] sm:$0xff]  ;;  %v89_v55 = vld [vmem:[#allocation3 + $0x140] sm:$0xff]  ;;  %v658_v56 = vpack.c.bf16 %v106_v49, %v105_v48  ;;  %v76_v59 = vld [vmem:[#allocation3 + $0xd8] sm:$0xff] }
  0x20   :  { %653 = vmatpush3.bf16.msra.mxu1 %v652_v38  ;;  %623 = vmatprep.subr.bf16.mxu0 %v622_v39  ;;  %v90_v57 = vld [vmem:[#allocation3 + $0x148] sm:$0xff]  ;;  %v107_v60 = vld [vmem:[#allocation3 + $0x1d0] sm:$0xff]  ;;  %v108_v61 = vld [vmem:[#allocation3 + $0x1d8] sm:$0xff]  ;;  %v628_v62 = vpack.c.bf16 %v58_v54, %v57_v53  ;;  %v630_v0 = vpack.c.bf16 %v76_v59, %v75_v58 }
  0x21   :  { %655 = vmatprep.subr.bf16.mxu1 %v654_v43  ;;  %v660_v63 = vpack.c.bf16 %v90_v57, %v89_v55  ;;  %v59_v1 = vld [vmem:[#allocation3 + $0x50] sm:$0xff]  ;;  %v60_v2 = vld [vmem:[#allocation3 + $0x58] sm:$0xff]  ;;  %v662_v4 = vpack.c.bf16 %v108_v61, %v107_v60  ;;  %v77_v6 = vld [vmem:[#allocation3 + $0xe0] sm:$0xff] }
  0x22   :  { %v91_v3 = vld [vmem:[#allocation3 + $0x150] sm:$0xff]  ;;  %v92_v5 = vld [vmem:[#allocation3 + $0x158] sm:$0xff]  ;;  %v78_v7 = vld [vmem:[#allocation3 + $0xe8] sm:$0xff]  ;;  %v632_v10 = vpack.c.bf16 %v60_v2, %v59_v1 }
  0x23   :  { %625 = vmatpush3.bf16.msra.mxu0 %v624_v50  ;;  %v109_v8 = vld [vmem:[#allocation3 + $0x1e0] sm:$0xff]  ;;  %v110_v9 = vld [vmem:[#allocation3 + $0x1e8] sm:$0xff]  ;;  %v664_v13 = vpack.c.bf16 %v92_v5, %v91_v3  ;;  %v634_v14 = vpack.c.bf16 %v78_v7, %v77_v6  ;;  %v44_v17 = vld [vmem:[%s830_s0 + $0x18] sm:$0xff] }
  0x24   :  { %657 = vmatpush3.bf16.msra.mxu1 %v656_v51  ;;  %627 = vmatprep.subr.bf16.mxu0 %v626_v52  ;;  %v61_v11 = vld [vmem:[#allocation3 + $0x60] sm:$0xff]  ;;  %v62_v12 = vld [vmem:[#allocation3 + $0x68] sm:$0xff]  ;;  %v666_v18 = vpack.c.bf16 %v110_v9, %v109_v8  ;;  %v79_v20 = vld [vmem:[#allocation3 + $0xf0] sm:$0xff] }
  0x25   :  { %659 = vmatprep.subr.bf16.mxu1 %v658_v56  ;;  %v93_v15 = vld [vmem:[#allocation3 + $0x160] sm:$0xff]  ;;  %v42_v16 = vld [vmem:[%s830_s0 + $0x8] sm:$0xff]  ;;  %v80_v21 = vld [vmem:[#allocation3 + $0xf8] sm:$0xff]  ;;  %311 = vmatprep.mubr.f32.mxu1 %v44_v17  ;;  %v636_v24 = vpack.c.bf16 %v62_v12, %v61_v11 }
  0x26   :  { %v94_v19 = vld [vmem:[#allocation3 + $0x168] sm:$0xff]  ;;  %241 = vmatprep.mubr.f32.mxu0 %v42_v16  ;;  %v111_v22 = vld [vmem:[#allocation3 + $0x1f0] sm:$0xff]  ;;  %v112_v23 = vld [vmem:[#allocation3 + $0x1f8] sm:$0xff]  ;;  %v638_v26 = vpack.c.bf16 %v80_v21, %v79_v20 }
  0x27   :  { %629 = vmatpush3.bf16.msra.mxu0 %v628_v62  ;;  %v668_v25 = vpack.c.bf16 %v94_v19, %v93_v15  ;;  %v63_v27 = vld [vmem:[#allocation3 + $0x70] sm:$0xff]  ;;  %v64_v28 = vld [vmem:[#allocation3 + $0x78] sm:$0xff]  ;;  %v670_v30 = vpack.c.bf16 %v112_v23, %v111_v22  ;;  %v129_v32 = vld [vmem:[#allocation3 + $0x280] sm:$0xff] }
  0x28   :  { %661 = vmatpush3.bf16.msra.mxu1 %v660_v63  ;;  %631 = vmatprep.subr.bf16.mxu0 %v630_v0  ;;  %v95_v29 = vld [vmem:[#allocation3 + $0x170] sm:$0xff]  ;;  %v96_v31 = vld [vmem:[#allocation3 + $0x178] sm:$0xff]  ;;  %v130_v33 = vld [vmem:[#allocation3 + $0x288] sm:$0xff]  ;;  %v640_v36 = vpack.c.bf16 %v64_v28, %v63_v27 }
  0x29   :  { %663 = vmatprep.subr.bf16.mxu1 %v662_v4  ;;  %v161_v34 = vld [vmem:[#allocation3 + $0x380] sm:$0xff]  ;;  %v162_v35 = vld [vmem:[#allocation3 + $0x388] sm:$0xff]  ;;  %v672_v37 = vpack.c.bf16 %v96_v31, %v95_v29  ;;  %v674_v38 = vpack.c.bf16 %v130_v33, %v129_v32  ;;  %v131_v44 = vld [vmem:[#allocation3 + $0x290] sm:$0xff] }
  0x2a   :  { %v113_v39 = vld [vmem:[#allocation3 + $0x200] sm:$0xff]  ;;  %v114_v40 = vld [vmem:[#allocation3 + $0x208] sm:$0xff]  ;;  %v706_v42 = vpack.c.bf16 %v162_v35, %v161_v34  ;;  %v132_v45 = vld [vmem:[#allocation3 + $0x298] sm:$0xff] }
  0x2b   :  { %633 = vmatpush3.bf16.msra.mxu0 %v632_v10  ;;  %v145_v41 = vld [vmem:[#allocation3 + $0x300] sm:$0xff]  ;;  %v146_v43 = vld [vmem:[#allocation3 + $0x308] sm:$0xff]  ;;  %v163_v46 = vld [vmem:[#allocation3 + $0x390] sm:$0xff]  ;;  %v676_v50 = vpack.c.bf16 %v114_v40, %v113_v39  ;;  %v678_v52 = vpack.c.bf16 %v132_v45, %v131_v44 }
  0x2c   :  { %665 = vmatpush3.bf16.msra.mxu1 %v664_v13  ;;  %635 = vmatprep.subr.bf16.mxu0 %v634_v14  ;;  %v164_v47 = vld [vmem:[#allocation3 + $0x398] sm:$0xff]  ;;  %v41_v48 = vld [vmem:[%s830_s0] sm:$0xff]  ;;  %v43_v49 = vld [vmem:[%s830_s0 + $0x10] sm:$0xff]  ;;  %v708_v51 = vpack.c.bf16 %v146_v43, %v145_v41 }
  0x2d   :  { %667 = vmatprep.subr.bf16.mxu1 %v666_v18  ;;  %v115_v53 = vld [vmem:[#allocation3 + $0x210] sm:$0xff]  ;;  %v116_v54 = vld [vmem:[#allocation3 + $0x218] sm:$0xff]  ;;  %v710_v56 = vpack.c.bf16 %v164_v47, %v163_v46  ;;  %v133_v58 = vld [vmem:[#allocation3 + $0x2a0] sm:$0xff] }
  0x2e   :  { %v147_v55 = vld [vmem:[#allocation3 + $0x310] sm:$0xff]  ;;  %v148_v57 = vld [vmem:[#allocation3 + $0x318] sm:$0xff]  ;;  %v134_v59 = vld [vmem:[#allocation3 + $0x2a8] sm:$0xff]  ;;  %v680_v62 = vpack.c.bf16 %v116_v54, %v115_v53 }
  0x2f   :  { %637 = vmatpush3.bf16.msra.mxu0 %v636_v24  ;;  %v165_v60 = vld [vmem:[#allocation3 + $0x3a0] sm:$0xff]  ;;  %v166_v61 = vld [vmem:[#allocation3 + $0x3a8] sm:$0xff]  ;;  %v712_v63 = vpack.c.bf16 %v148_v57, %v147_v55  ;;  %v682_v0 = vpack.c.bf16 %v134_v59, %v133_v58  ;;  %v135_v6 = vld [vmem:[#allocation3 + $0x2b0] sm:$0xff] }
  0x30   :  { %669 = vmatpush3.bf16.msra.mxu1 %v668_v25  ;;  %639 = vmatprep.subr.bf16.mxu0 %v638_v26  ;;  %v117_v1 = vld [vmem:[#allocation3 + $0x220] sm:$0xff]  ;;  %v118_v2 = vld [vmem:[#allocation3 + $0x228] sm:$0xff]  ;;  %v714_v4 = vpack.c.bf16 %v166_v61, %v165_v60  ;;  %v136_v7 = vld [vmem:[#allocation3 + $0x2b8] sm:$0xff] }
  0x31   :  { %671 = vmatprep.subr.bf16.mxu1 %v670_v30  ;;  %v149_v3 = vld [vmem:[#allocation3 + $0x320] sm:$0xff]  ;;  %v150_v5 = vld [vmem:[#allocation3 + $0x328] sm:$0xff]  ;;  %v167_v8 = vld [vmem:[#allocation3 + $0x3b0] sm:$0xff]  ;;  %v684_v10 = vpack.c.bf16 %v118_v2, %v117_v1  ;;  %v686_v12 = vpack.c.bf16 %v136_v7, %v135_v6 }
  0x32   :  { %v168_v9 = vld [vmem:[#allocation3 + $0x3b8] sm:$0xff]  ;;  %v716_v11 = vpack.c.bf16 %v150_v5, %v149_v3  ;;  %v119_v13 = vld [vmem:[#allocation3 + $0x230] sm:$0xff]  ;;  %v137_v18 = vld [vmem:[#allocation3 + $0x2c0] sm:$0xff] }
  0x33   :  { %641 = vmatpush3.bf16.msra.mxu0 %v640_v36  ;;  %v120_v14 = vld [vmem:[#allocation3 + $0x238] sm:$0xff]  ;;  %v151_v15 = vld [vmem:[#allocation3 + $0x330] sm:$0xff]  ;;  %v718_v16 = vpack.c.bf16 %v168_v9, %v167_v8  ;;  %v138_v19 = vld [vmem:[#allocation3 + $0x2c8] sm:$0xff] }
  0x34   :  { %673 = vmatpush3.bf16.msra.mxu1 %v672_v37  ;;  %675 = vmatprep.subr.bf16.mxu0 %v674_v38  ;;  %v152_v17 = vld [vmem:[#allocation3 + $0x338] sm:$0xff]  ;;  %v169_v20 = vld [vmem:[#allocation3 + $0x3c0] sm:$0xff]  ;;  %v170_v21 = vld [vmem:[#allocation3 + $0x3c8] sm:$0xff]  ;;  %v688_v22 = vpack.c.bf16 %v120_v14, %v119_v13  ;;  %v690_v26 = vpack.c.bf16 %v138_v19, %v137_v18 }
  0x35   :  { %707 = vmatprep.subr.bf16.mxu1 %v706_v42  ;;  %v46_v23 = vld [vmem:[%s830_s0 + $0x28] sm:$0xff]  ;;  %v48_v24 = vld [vmem:[%s830_s0 + $0x38] sm:$0xff]  ;;  %v720_v25 = vpack.c.bf16 %v152_v17, %v151_v15  ;;  %v121_v27 = vld [vmem:[#allocation3 + $0x240] sm:$0xff]  ;;  %v722_v30 = vpack.c.bf16 %v170_v21, %v169_v20 }
  0x36   :  { %242 = vmatmul.mubr.f32.vlgmr.msra.gmra.mrb[0].mxu0 %v41_v48  ;;  %v122_v28 = vld [vmem:[#allocation3 + $0x248] sm:$0xff]  ;;  %v153_v29 = vld [vmem:[#allocation3 + $0x340] sm:$0xff]  ;;  %v139_v32 = vld [vmem:[#allocation3 + $0x2d0] sm:$0xff] }
  0x37   :  { %312 = vmatmul.mubr.f32.vlgmr.msra.gmra.mrb[0].mxu1 %v43_v49  ;;  %677 = vmatpush3.bf16.msra.mxu0 %v676_v50  ;;  %v154_v31 = vld [vmem:[#allocation3 + $0x348] sm:$0xff]  ;;  %v140_v33 = vld [vmem:[#allocation3 + $0x2d8] sm:$0xff]  ;;  %v171_v34 = vld [vmem:[#allocation3 + $0x3d0] sm:$0xff]  ;;  %v692_v36 = vpack.c.bf16 %v122_v28, %v121_v27 }
  0x38   :  { %709 = vmatpush3.bf16.msra.mxu1 %v708_v51  ;;  %679 = vmatprep.subr.bf16.mxu0 %v678_v52  ;;  %v172_v35 = vld [vmem:[#allocation3 + $0x3d8] sm:$0xff]  ;;  %v724_v37 = vpack.c.bf16 %v154_v31, %v153_v29  ;;  %v694_v38 = vpack.c.bf16 %v140_v33, %v139_v32  ;;  %v123_v39 = vld [vmem:[#allocation3 + $0x250] sm:$0xff]  ;;  %v141_v44 = vld [vmem:[#allocation3 + $0x2e0] sm:$0xff] }
  0x39   :  { %711 = vmatprep.subr.bf16.mxu1 %v710_v56  ;;  %381 = vmatprep.mubr.f32.mxu0 %v46_v23  ;;  %v124_v40 = vld [vmem:[#allocation3 + $0x258] sm:$0xff]  ;;  %v155_v41 = vld [vmem:[#allocation3 + $0x350] sm:$0xff]  ;;  %v726_v42 = vpack.c.bf16 %v172_v35, %v171_v34  ;;  %v142_v45 = vld [vmem:[#allocation3 + $0x2e8] sm:$0xff] }
  0x3a   :  { %451 = vmatprep.mubr.f32.mxu1 %v48_v24  ;;  %v156_v43 = vld [vmem:[#allocation3 + $0x358] sm:$0xff]  ;;  %v173_v46 = vld [vmem:[#allocation3 + $0x3e0] sm:$0xff]  ;;  %v174_v47 = vld [vmem:[#allocation3 + $0x3e8] sm:$0xff]  ;;  %v696_v48 = vpack.c.bf16 %v124_v40, %v123_v39  ;;  %v698_v50 = vpack.c.bf16 %v142_v45, %v141_v44 }
  0x3b   :  { %681 = vmatpush3.bf16.msra.mxu0 %v680_v62  ;;  %v728_v49 = vpack.c.bf16 %v156_v43, %v155_v41  ;;  %v125_v51 = vld [vmem:[#allocation3 + $0x260] sm:$0xff]  ;;  %v126_v52 = vld [vmem:[#allocation3 + $0x268] sm:$0xff]  ;;  %v730_v54 = vpack.c.bf16 %v174_v47, %v173_v46  ;;  %v143_v56 = vld [vmem:[#allocation3 + $0x2f0] sm:$0xff] }
  0x3c   :  { %713 = vmatpush3.bf16.msra.mxu1 %v712_v63  ;;  %683 = vmatprep.subr.bf16.mxu0 %v682_v0  ;;  %v157_v53 = vld [vmem:[#allocation3 + $0x360] sm:$0xff]  ;;  %v158_v55 = vld [vmem:[#allocation3 + $0x368] sm:$0xff]  ;;  %v144_v57 = vld [vmem:[#allocation3 + $0x2f8] sm:$0xff]  ;;  %v700_v60 = vpack.c.bf16 %v126_v52, %v125_v51 }
  0x3d   :  { %715 = vmatprep.subr.bf16.mxu1 %v714_v4  ;;  %v175_v58 = vld [vmem:[#allocation3 + $0x3f0] sm:$0xff]  ;;  %v176_v59 = vld [vmem:[#allocation3 + $0x3f8] sm:$0xff]  ;;  %v732_v61 = vpack.c.bf16 %v158_v55, %v157_v53  ;;  %v702_v62 = vpack.c.bf16 %v144_v57, %v143_v56  ;;  %v45_v6 = vld [vmem:[%s830_s0 + $0x20] sm:$0xff] }
  0x3e   :  { %v127_v63 = vld [vmem:[#allocation3 + $0x270] sm:$0xff]  ;;  %v128_v0 = vld [vmem:[#allocation3 + $0x278] sm:$0xff]  ;;  %v734_v1 = vpack.c.bf16 %v176_v59, %v175_v58 }
  0x3f   :  { %685 = vmatpush3.bf16.msra.mxu0 %v684_v10  ;;  %v159_v2 = vld [vmem:[#allocation3 + $0x370] sm:$0xff]  ;;  %v160_v3 = vld [vmem:[#allocation3 + $0x378] sm:$0xff]  ;;  %v704_v4 = vpack.c.bf16 %v128_v0, %v127_v63 }
  0x40   :  { %717 = vmatpush3.bf16.msra.mxu1 %v716_v11  ;;  %687 = vmatprep.subr.bf16.mxu0 %v686_v12  ;;  %v736_v5 = vpack.c.bf16 %v160_v3, %v159_v2  ;;  %v47_v7 = vld [vmem:[%s830_s0 + $0x30] sm:$0xff] }
  0x41   :  { %719 = vmatprep.subr.bf16.mxu1 %v718_v16 }
  0x43   :  { %689 = vmatpush3.bf16.msra.mxu0 %v688_v22  ;;  %v469_v22 = vld [vmem:[%s832_s2] ss:$0 sm:$0xff] }
  0x44   :  { %721 = vmatpush3.bf16.msra.mxu1 %v720_v25  ;;  %691 = vmatprep.subr.bf16.mxu0 %v690_v26 }
  0x45   :  { %723 = vmatprep.subr.bf16.mxu1 %v722_v30 }
  0x47   :  { %693 = vmatpush3.bf16.msra.mxu0 %v692_v36 }
  0x48   :  { %725 = vmatpush3.bf16.msra.mxu1 %v724_v37  ;;  %695 = vmatprep.subr.bf16.mxu0 %v694_v38 }
  0x49   :  { %727 = vmatprep.subr.bf16.mxu1 %v726_v42 }
  0x4b   :  { %697 = vmatpush3.bf16.msra.mxu0 %v696_v48 }
  0x4c   :  { %729 = vmatpush3.bf16.msra.mxu1 %v728_v49  ;;  %699 = vmatprep.subr.bf16.mxu0 %v698_v50 }
  0x4d   :  { %731 = vmatprep.subr.bf16.mxu1 %v730_v54 }
  0x4f   :  { %701 = vmatpush3.bf16.msra.mxu0 %v700_v60 }
  0x50   :  { %733 = vmatpush3.bf16.msra.mxu1 %v732_v61  ;;  %703 = vmatprep.subr.bf16.mxu0 %v702_v62 }
  0x51   :  { %735 = vmatprep.subr.bf16.mxu1 %v734_v1 }
  0x53   :  { %705 = vmatpush3.bf16.msra.mxu0 %v704_v4 }
  0x54   :  { %737 = vmatpush3.bf16.msra.mxu1 %v736_v5 }
  0x56   :  { %382 = vmatmul.mubr.f32.vlgmr.msra.gmra.mrb[2].mxu0 %v45_v6 }
  0x57   :  { %452 = vmatmul.mubr.f32.vlgmr.msra.gmra.mrb[2].mxu1 %v47_v7 }
 0x109   :  { %v502_v8 = vpop.f32.mrb[0].mxu0 }
 0x10a   :  { %v537_v9 = vpop.f32.mrb[0].mxu1  ;;  %v503_v10 = vpop.f32.mrb[1].mxu0 }
 0x10b   :  { %v504_v11 = vadd.f32 %v503_v10, %v502_v8  ;;  %v538_v12 = vpop.f32.mrb[1].mxu1 }
 0x10c   :  { %v539_v13 = vadd.f32 %v538_v12, %v537_v9 }
 0x10e   :  { %v314_v14 = vadd.f32 %v539_v13, %v504_v11 }
 0x129   :  { %v572_v15 = vpop.f32.mrb[2].mxu0 }
 0x12a   :  { %v573_v16 = vpop.f32.mrb[3].mxu0  ;;  %v607_v17 = vpop.f32.mrb[2].mxu1 }
 0x12b   :  { %v574_v18 = vadd.f32 %v573_v16, %v572_v15  ;;  %v608_v19 = vpop.f32.mrb[3].mxu1 }
 0x12c   :  { %v609_v20 = vadd.f32 %v608_v19, %v607_v17 }
 0x12d   :  { %v384_v21 = vadd.f32 %v574_v18, %v314_v14 }
 0x12f   :  { %v454_v23 = vadd.f32 %v609_v20, %v384_v21 }
 0x131   :  { %v457_v24 = vadd.f32 %v469_v22, %v454_v23 }
 0x133   :  { %463 = vst [vmem:[%s833_s3] sm:$0xff] %v457_v24 }
 0x134   :  { %468 = vsyncpa [#allocation4], 1 }

</bundles_post_ra>
